<compile_context>
chip_gen: v6e
topology: v6e:2x2x1
jax: 0.10.0
libtpu: 0.0.40
codegen_flags: <defaults>
</compile_context>

<pallas_src>
from functools import partial

import jax
import jax.numpy as jnp
from jax.experimental import pallas as pl
from jax.experimental.pallas import tpu as pltpu

IN_CH = 2      # fusion_layer in_channels (x-channel + y-channel)
OUT_CH = 1     # fusion_layer out_channels
K = 3          # kernel_size
PAD = 1        # padding


def fusion_kernel(wb_ref, mask_ref, x_ref, y_ref, out_ref, *, H, W):
    """Fused concat + 3x3 conv (2->1 ch, pad=1) + sigmoid on lane-dense tiles.

    wb_ref  : SMEM (19,) f32     -- 18 conv weights (c-major, kh, kw) + bias at [18]
    mask_ref: VMEM (8, H*W) f32  -- precomputed halo masks, one row per non-center tap
    x_ref   : VMEM (TB, H*W)     -- channel-0 planes, rows flattened into lanes
    y_ref   : VMEM (TB, H*W)     -- channel-1 planes
    out_ref : VMEM (TB, H*W)
    """
    HW = H * W

    # Two lane-dense plane loads; in-register upcast (no-op for f32 inputs).
    x0 = x_ref[...].astype(jnp.float32)
    x1 = y_ref[...].astype(jnp.float32)

    # Hoist all scalar weight / bias reads out of the tap loop.
    w = [wb_ref[i] for i in range(IN_CH * K * K)]
    bias = wb_ref[IN_CH * K * K]

    acc = None
    row = 0
    for kh in range(K):
        dh = kh - PAD
        for kw in range(K):
            dw = kw - PAD
            # Fold both channels into one plane per tap (rolling is linear).
            v = (w[0 * K * K + kh * K + kw] * x0
                 + w[1 * K * K + kh * K + kw] * x1)
            d = dh * W + dw                          # shift in flattened (H*W) space
            if d != 0:
                v = pltpu.roll(v, (-d) % HW, axis=1)  # XLU lane rotate
            if (dh, dw) != (0, 0):
                # One multiply by the resident precomputed halo mask replaces
                # the old per-step iota/rem/compare/AND/select chain.
                v = v * mask_ref[pl.ds(row, 1), :]
                row += 1
            acc = v if acc is None else acc + v

    z = acc + bias
    # sigmoid(z) = 0.5*tanh(z/2) + 0.5 : one EUP op, keeps the divide off the VALU slot.
    out_ref[...] = (0.5 * jnp.tanh(0.5 * z) + 0.5).astype(out_ref.dtype)


def _vmem_capacity_bytes():
    try:
        info = pltpu.get_tpu_info()
        cap = getattr(info, "vmem_capacity_bytes", None)
        if cap:
            return int(cap)
    except Exception:
        pass
    return 64 << 20      # conservative fallback = v7x per-TensorCore VMEM


def _halo_masks(H, W):
    """(8, H*W) f32 validity masks for the 8 non-center 3x3 taps (zero halo)."""
    flat = jnp.arange(H * W, dtype=jnp.int32)
    col = flat % W
    ones = jnp.ones((H * W,), dtype=bool)
    mh = {-1: flat >= W, 0: ones, 1: flat < (H - 1) * W}
    mw = {-1: col >= 1, 0: ones, 1: col < (W - 1)}
    rows = []
    for kh in range(K):
        for kw in range(K):
            dh, dw = kh - PAD, kw - PAD
            if (dh, dw) == (0, 0):
                continue
            rows.append((mh[dh] & mw[dw]).astype(jnp.float32))
    return jnp.stack(rows)    # (8, H*W)


def fusion_forward(x, y, weight, bias):
    """x, y: (N, 1, H, W). weight: (1, 2, 3, 3). bias: (1,)."""
    N, _, H, W = x.shape
    HW = H * W
    out_dtype = jnp.promote_types(x.dtype, y.dtype)

    # Layout plumbing only (free reshapes, no dtype cast -> no extra HBM pass).
    x2 = x.reshape(N, HW)
    y2 = y.reshape(N, HW)
    wb = jnp.concatenate([weight.reshape(-1), bias.reshape(-1)]).astype(jnp.float32)
    masks = _halo_masks(H, W)

    # ---- tile sizing (re-derived per generation from VMEM capacity) --------
    cap = _vmem_capacity_bytes()
    vmem_limit = min(3 * cap // 4, 96 << 20)   # ~48 MiB on v7x, 96 MiB on v5e/v6e
    per_row = HW * 2 * (x2.dtype.itemsize + y2.dtype.itemsize
                        + jnp.dtype(out_dtype).itemsize)     # x+y+out, double-buffered
    mask_bytes = 2 * masks.size * 4
    budget = max(vmem_limit - (8 << 20) - mask_bytes, 4 << 20)
    tb_vmem = max(8, (budget // per_row) // 8 * 8)

    if N <= 8:
        TB = N                                  # full sublane extent -> legal block
    else:
        # >=2 grid steps so both v7x TensorCores get work; sublane-aligned tiles
        # capped by the VMEM budget.
        tb_split = -(-pl.cdiv(N, 2) // 8) * 8
        TB = max(8, min(tb_split, tb_vmem))
    grid = (pl.cdiv(N, TB),)

    out = pl.pallas_call(
        partial(fusion_kernel, H=H, W=W),
        out_shape=jax.ShapeDtypeStruct((N, HW), out_dtype),
        grid=grid,
        in_specs=[
            pl.BlockSpec(memory_space=pltpu.MemorySpace.SMEM),   # weights + bias table
            pl.BlockSpec((8, HW), lambda b: (0, 0)),             # halo masks (resident)
            pl.BlockSpec((TB, HW), lambda b: (b, 0)),            # x planes
            pl.BlockSpec((TB, HW), lambda b: (b, 0)),            # y planes
        ],
        out_specs=pl.BlockSpec((TB, HW), lambda b: (b, 0)),
        compiler_params=pltpu.CompilerParams(
            dimension_semantics=("parallel",),
            vmem_limit_bytes=vmem_limit,
        ),
    )(wb, masks, x2, y2)

    return out.reshape(N, OUT_CH, H, W)


def reference_forward(x, y, weight, bias):
    concat = jnp.concatenate([x, y], axis=1)
    fused = jax.lax.conv_general_dilated(
        concat, weight, window_strides=(1, 1), padding=((PAD, PAD), (PAD, PAD)),
        dimension_numbers=("NCHW", "OIHW", "NCHW"))
    return jax.nn.sigmoid(fused + bias.reshape(1, OUT_CH, 1, 1))


if __name__ == "__main__":
    key = jax.random.PRNGKey(0)
    kx, ky, kw, kb = jax.random.split(key, 4)

    N, H, W = 2, 16, 16
    x = jax.random.normal(kx, (N, 1, H, W), dtype=jnp.float32)
    y = jax.random.normal(ky, (N, 1, H, W), dtype=jnp.float32)

    # Deterministic synthetic parameters (PyTorch-like uniform init, bound = 1/sqrt(fan_in))
    fan_in = IN_CH * K * K
    bound = 1.0 / (fan_in ** 0.5)
    weight = jax.random.uniform(kw, (OUT_CH, IN_CH, K, K),
                                minval=-bound, maxval=bound, dtype=jnp.float32)
    bias = jax.random.uniform(kb, (OUT_CH,), minval=-bound, maxval=bound,
                              dtype=jnp.float32)

    out = fusion_forward(x, y, weight, bias)
    out = jax.block_until_ready(out)

    ref = reference_forward(x, y, weight, bias)
    assert out.shape == (N, OUT_CH, H, W)
    assert jnp.allclose(out, ref, atol=1e-5, rtol=1e-5), "mismatch vs reference conv"

    print("KERNEL_OK")
</pallas_src>

<mosaic_0001>
module attributes {stable_mosaic.version = 11 : i64} {
  func.func @fusion_kernel(%arg0: i32, %arg1: memref<19xf32, #tpu.memory_space<smem>>, %arg2: memref<8x256xf32, #tpu.memory_space<vmem>>, %arg3: memref<2x256xf32, #tpu.memory_space<vmem>>, %arg4: memref<2x256xf32, #tpu.memory_space<vmem>>, %arg5: memref<2x256xf32, #tpu.memory_space<vmem>>) attributes {dimension_semantics = [#tpu.dimension_semantics<parallel>], iteration_bounds = array<i64: 1>, scalar_prefetch = 0 : i64, scratch_operands = 0 : i64, tpu.core_type = #tpu.core_type<tc>, window_params = [{transform_indices = @transform_0, window_bounds = array<i64: 19>}, {pipeline_mode = #tpu.pipeline_mode<synchronous>, transform_indices = @transform_1, window_bounds = array<i64: 8, 256>}, {transform_indices = @transform_2, window_bounds = array<i64: 2, 256>}, {transform_indices = @transform_3, window_bounds = array<i64: 2, 256>}, {transform_indices = @transform_4, window_bounds = array<i64: 2, 256>}]} {
    %c0 = arith.constant 0 : index
    %c0_0 = arith.constant 0 : index
    %0 = vector.load %arg3[%c0, %c0_0] : memref<2x256xf32, #tpu.memory_space<vmem>>, vector<2x256xf32>
    %c0_1 = arith.constant 0 : index
    %c0_2 = arith.constant 0 : index
    %1 = vector.load %arg4[%c0_1, %c0_2] : memref<2x256xf32, #tpu.memory_space<vmem>>, vector<2x256xf32>
    %c0_3 = arith.constant 0 : index
    %2 = memref.load %arg1[%c0_3] : memref<19xf32, #tpu.memory_space<smem>>
    %c1 = arith.constant 1 : index
    %3 = memref.load %arg1[%c1] : memref<19xf32, #tpu.memory_space<smem>>
    %c2 = arith.constant 2 : index
    %4 = memref.load %arg1[%c2] : memref<19xf32, #tpu.memory_space<smem>>
    %c3 = arith.constant 3 : index
    %5 = memref.load %arg1[%c3] : memref<19xf32, #tpu.memory_space<smem>>
    %c4 = arith.constant 4 : index
    %6 = memref.load %arg1[%c4] : memref<19xf32, #tpu.memory_space<smem>>
    %c5 = arith.constant 5 : index
    %7 = memref.load %arg1[%c5] : memref<19xf32, #tpu.memory_space<smem>>
    %c6 = arith.constant 6 : index
    %8 = memref.load %arg1[%c6] : memref<19xf32, #tpu.memory_space<smem>>
    %c7 = arith.constant 7 : index
    %9 = memref.load %arg1[%c7] : memref<19xf32, #tpu.memory_space<smem>>
    %c8 = arith.constant 8 : index
    %10 = memref.load %arg1[%c8] : memref<19xf32, #tpu.memory_space<smem>>
    %c9 = arith.constant 9 : index
    %11 = memref.load %arg1[%c9] : memref<19xf32, #tpu.memory_space<smem>>
    %c10 = arith.constant 10 : index
    %12 = memref.load %arg1[%c10] : memref<19xf32, #tpu.memory_space<smem>>
    %c11 = arith.constant 11 : index
    %13 = memref.load %arg1[%c11] : memref<19xf32, #tpu.memory_space<smem>>
    %c12 = arith.constant 12 : index
    %14 = memref.load %arg1[%c12] : memref<19xf32, #tpu.memory_space<smem>>
    %c13 = arith.constant 13 : index
    %15 = memref.load %arg1[%c13] : memref<19xf32, #tpu.memory_space<smem>>
    %c14 = arith.constant 14 : index
    %16 = memref.load %arg1[%c14] : memref<19xf32, #tpu.memory_space<smem>>
    %c15 = arith.constant 15 : index
    %17 = memref.load %arg1[%c15] : memref<19xf32, #tpu.memory_space<smem>>
    %c16 = arith.constant 16 : index
    %18 = memref.load %arg1[%c16] : memref<19xf32, #tpu.memory_space<smem>>
    %c17 = arith.constant 17 : index
    %19 = memref.load %arg1[%c17] : memref<19xf32, #tpu.memory_space<smem>>
    %c18 = arith.constant 18 : index
    %20 = memref.load %arg1[%c18] : memref<19xf32, #tpu.memory_space<smem>>
    %21 = vector.broadcast %2 : f32 to vector<2x256xf32>
    %22 = arith.mulf %21, %0 : vector<2x256xf32>
    %23 = vector.broadcast %11 : f32 to vector<2x256xf32>
    %24 = arith.mulf %23, %1 : vector<2x256xf32>
    %25 = arith.addf %22, %24 : vector<2x256xf32>
    %c17_i32 = arith.constant 17 : i32
    %26 = tpu.dynamic_rotate %25 by %c17_i32 dim 1 : vector<2x256xf32>, i32 -> vector<2x256xf32>
    %c0_4 = arith.constant 0 : index
    %c0_5 = arith.constant 0 : index
    %27 = vector.load %arg2[%c0_4, %c0_5] : memref<8x256xf32, #tpu.memory_space<vmem>>, vector<1x256xf32>
    %28 = vector.broadcast %27 : vector<1x256xf32> to vector<2x256xf32>
    %29 = arith.mulf %26, %28 : vector<2x256xf32>
    %30 = vector.broadcast %3 : f32 to vector<2x256xf32>
    %31 = arith.mulf %30, %0 : vector<2x256xf32>
    %32 = vector.broadcast %12 : f32 to vector<2x256xf32>
    %33 = arith.mulf %32, %1 : vector<2x256xf32>
    %34 = arith.addf %31, %33 : vector<2x256xf32>
    %c16_i32 = arith.constant 16 : i32
    %35 = tpu.dynamic_rotate %34 by %c16_i32 dim 1 : vector<2x256xf32>, i32 -> vector<2x256xf32>
    %c1_6 = arith.constant 1 : index
    %c0_7 = arith.constant 0 : index
    %36 = vector.load %arg2[%c1_6, %c0_7] : memref<8x256xf32, #tpu.memory_space<vmem>>, vector<1x256xf32>
    %37 = vector.broadcast %36 : vector<1x256xf32> to vector<2x256xf32>
    %38 = arith.mulf %35, %37 : vector<2x256xf32>
    %39 = arith.addf %29, %38 : vector<2x256xf32>
    %40 = vector.broadcast %4 : f32 to vector<2x256xf32>
    %41 = arith.mulf %40, %0 : vector<2x256xf32>
    %42 = vector.broadcast %13 : f32 to vector<2x256xf32>
    %43 = arith.mulf %42, %1 : vector<2x256xf32>
    %44 = arith.addf %41, %43 : vector<2x256xf32>
    %c15_i32 = arith.constant 15 : i32
    %45 = tpu.dynamic_rotate %44 by %c15_i32 dim 1 : vector<2x256xf32>, i32 -> vector<2x256xf32>
    %c2_8 = arith.constant 2 : index
    %c0_9 = arith.constant 0 : index
    %46 = vector.load %arg2[%c2_8, %c0_9] : memref<8x256xf32, #tpu.memory_space<vmem>>, vector<1x256xf32>
    %47 = vector.broadcast %46 : vector<1x256xf32> to vector<2x256xf32>
    %48 = arith.mulf %45, %47 : vector<2x256xf32>
    %49 = arith.addf %39, %48 : vector<2x256xf32>
    %50 = vector.broadcast %5 : f32 to vector<2x256xf32>
    %51 = arith.mulf %50, %0 : vector<2x256xf32>
    %52 = vector.broadcast %14 : f32 to vector<2x256xf32>
    %53 = arith.mulf %52, %1 : vector<2x256xf32>
    %54 = arith.addf %51, %53 : vector<2x256xf32>
    %c1_i32 = arith.constant 1 : i32
    %55 = tpu.dynamic_rotate %54 by %c1_i32 dim 1 : vector<2x256xf32>, i32 -> vector<2x256xf32>
    %c3_10 = arith.constant 3 : index
    %c0_11 = arith.constant 0 : index
    %56 = vector.load %arg2[%c3_10, %c0_11] : memref<8x256xf32, #tpu.memory_space<vmem>>, vector<1x256xf32>
    %57 = vector.broadcast %56 : vector<1x256xf32> to vector<2x256xf32>
    %58 = arith.mulf %55, %57 : vector<2x256xf32>
    %59 = arith.addf %49, %58 : vector<2x256xf32>
    %60 = vector.broadcast %6 : f32 to vector<2x256xf32>
    %61 = arith.mulf %60, %0 : vector<2x256xf32>
    %62 = vector.broadcast %15 : f32 to vector<2x256xf32>
    %63 = arith.mulf %62, %1 : vector<2x256xf32>
    %64 = arith.addf %61, %63 : vector<2x256xf32>
    %65 = arith.addf %59, %64 : vector<2x256xf32>
    %66 = vector.broadcast %7 : f32 to vector<2x256xf32>
    %67 = arith.mulf %66, %0 : vector<2x256xf32>
    %68 = vector.broadcast %16 : f32 to vector<2x256xf32>
    %69 = arith.mulf %68, %1 : vector<2x256xf32>
    %70 = arith.addf %67, %69 : vector<2x256xf32>
    %c255_i32 = arith.constant 255 : i32
    %71 = tpu.dynamic_rotate %70 by %c255_i32 dim 1 : vector<2x256xf32>, i32 -> vector<2x256xf32>
    %c4_12 = arith.constant 4 : index
    %c0_13 = arith.constant 0 : index
    %72 = vector.load %arg2[%c4_12, %c0_13] : memref<8x256xf32, #tpu.memory_space<vmem>>, vector<1x256xf32>
    %73 = vector.broadcast %72 : vector<1x256xf32> to vector<2x256xf32>
    %74 = arith.mulf %71, %73 : vector<2x256xf32>
    %75 = arith.addf %65, %74 : vector<2x256xf32>
    %76 = vector.broadcast %8 : f32 to vector<2x256xf32>
    %77 = arith.mulf %76, %0 : vector<2x256xf32>
    %78 = vector.broadcast %17 : f32 to vector<2x256xf32>
    %79 = arith.mulf %78, %1 : vector<2x256xf32>
    %80 = arith.addf %77, %79 : vector<2x256xf32>
    %c241_i32 = arith.constant 241 : i32
    %81 = tpu.dynamic_rotate %80 by %c241_i32 dim 1 : vector<2x256xf32>, i32 -> vector<2x256xf32>
    %c5_14 = arith.constant 5 : index
    %c0_15 = arith.constant 0 : index
    %82 = vector.load %arg2[%c5_14, %c0_15] : memref<8x256xf32, #tpu.memory_space<vmem>>, vector<1x256xf32>
    %83 = vector.broadcast %82 : vector<1x256xf32> to vector<2x256xf32>
    %84 = arith.mulf %81, %83 : vector<2x256xf32>
    %85 = arith.addf %75, %84 : vector<2x256xf32>
    %86 = vector.broadcast %9 : f32 to vector<2x256xf32>
    %87 = arith.mulf %86, %0 : vector<2x256xf32>
    %88 = vector.broadcast %18 : f32 to vector<2x256xf32>
    %89 = arith.mulf %88, %1 : vector<2x256xf32>
    %90 = arith.addf %87, %89 : vector<2x256xf32>
    %c240_i32 = arith.constant 240 : i32
    %91 = tpu.dynamic_rotate %90 by %c240_i32 dim 1 : vector<2x256xf32>, i32 -> vector<2x256xf32>
    %c6_16 = arith.constant 6 : index
    %c0_17 = arith.constant 0 : index
    %92 = vector.load %arg2[%c6_16, %c0_17] : memref<8x256xf32, #tpu.memory_space<vmem>>, vector<1x256xf32>
    %93 = vector.broadcast %92 : vector<1x256xf32> to vector<2x256xf32>
    %94 = arith.mulf %91, %93 : vector<2x256xf32>
    %95 = arith.addf %85, %94 : vector<2x256xf32>
    %96 = vector.broadcast %10 : f32 to vector<2x256xf32>
    %97 = arith.mulf %96, %0 : vector<2x256xf32>
    %98 = vector.broadcast %19 : f32 to vector<2x256xf32>
    %99 = arith.mulf %98, %1 : vector<2x256xf32>
    %100 = arith.addf %97, %99 : vector<2x256xf32>
    %c239_i32 = arith.constant 239 : i32
    %101 = tpu.dynamic_rotate %100 by %c239_i32 dim 1 : vector<2x256xf32>, i32 -> vector<2x256xf32>
    %c7_18 = arith.constant 7 : index
    %c0_19 = arith.constant 0 : index
    %102 = vector.load %arg2[%c7_18, %c0_19] : memref<8x256xf32, #tpu.memory_space<vmem>>, vector<1x256xf32>
    %103 = vector.broadcast %102 : vector<1x256xf32> to vector<2x256xf32>
    %104 = arith.mulf %101, %103 : vector<2x256xf32>
    %105 = arith.addf %95, %104 : vector<2x256xf32>
    %106 = vector.broadcast %20 : f32 to vector<2x256xf32>
    %107 = arith.addf %105, %106 : vector<2x256xf32>
    %cst = arith.constant 5.000000e-01 : f32
    %108 = vector.broadcast %cst : f32 to vector<2x256xf32>
    %109 = arith.mulf %108, %107 : vector<2x256xf32>
    %110 = math.tanh %109 : vector<2x256xf32>
    %cst_20 = arith.constant 5.000000e-01 : f32
    %111 = vector.broadcast %cst_20 : f32 to vector<2x256xf32>
    %112 = arith.mulf %111, %110 : vector<2x256xf32>
    %cst_21 = arith.constant 5.000000e-01 : f32
    %113 = vector.broadcast %cst_21 : f32 to vector<2x256xf32>
    %114 = arith.addf %112, %113 : vector<2x256xf32>
    %c0_22 = arith.constant 0 : index
    %c0_23 = arith.constant 0 : index
    %115 = vector.load %arg5[%c0_22, %c0_23] : memref<2x256xf32, #tpu.memory_space<vmem>>, vector<2x256xf32>
    tpu.vector_store %arg5[%c0_22, %c0_23], %114 {strides = array<i32>} : memref<2x256xf32, #tpu.memory_space<vmem>>, vector<2x256xf32>,
    return
  }
  func.func @transform_0(%arg0: i32) -> i32 {
    %c0_i32 = arith.constant 0 : i32
    %c0_i32_0 = arith.constant 0 : i32
    return %c0_i32 : i32
  }
  func.func @transform_1(%arg0: i32) -> (i32, i32) {
    %c0_i32 = arith.constant 0 : i32
    %c0_i32_0 = arith.constant 0 : i32
    %c0_i32_1 = arith.constant 0 : i32
    return %c0_i32, %c0_i32_0 : i32, i32
  }
  func.func @transform_2(%arg0: i32) -> (i32, i32) {
    %c0_i32 = arith.constant 0 : i32
    %c0_i32_0 = arith.constant 0 : i32
    return %arg0, %c0_i32 : i32, i32
  }
  func.func @transform_3(%arg0: i32) -> (i32, i32) {
    %c0_i32 = arith.constant 0 : i32
    %c0_i32_0 = arith.constant 0 : i32
    return %arg0, %c0_i32 : i32, i32
  }
  func.func @transform_4(%arg0: i32) -> (i32, i32) {
    %c0_i32 = arith.constant 0 : i32
    %c0_i32_0 = arith.constant 0 : i32
    return %arg0, %c0_i32 : i32, i32
  }
}

</mosaic_0001>

<bundles_post_ra>
// kernel: tpu_custom_call.1
= control target key start
LH: loop header
LB: loop body
LE: loop exit
PB: predicated region body
PF: predicated region fallthrough
CT: control target
= control target key end

     0   :  { %9 = vsyncpa [#allocation5], 0  ;;  %s725_s0 = inlined_call_operand.hbm [shape: f32[19], index: 0, kind: input, shape index: {}]   ;;  %s726_s1 = inlined_call_operand.hbm [shape: f32[8,256], index: 1, kind: input, shape index: {}]   ;;  %s727_s2 = inlined_call_operand.hbm [shape: f32[2,256], index: 2, kind: input, shape index: {}]   ;;  %s728_s3 = inlined_call_operand.vmem [shape: f32[2,256], index: 3, kind: input, shape index: {}]   ;;  %s729_s4 = inlined_call_operand.hbm [shape: f32[2,256], index: 4, kind: output, shape index: {}]  }
   0x1   :  { %10 = vsyncpa [#allocation3], 0 }
   0x2   :  { %11 = vsyncpa [#allocation8], 0 }
   0x3   :  { %12 = vsyncpa [#allocation4], 0  ;;  %s563_s15 = smov [#allocation2]   ;;  %s564_s18 = smov [#allocation6]  }
   0x4   :  { %20 = dma.hbm_to_smem %s725_s0, 16, %s563_s15, [#allocation5]  }
   0x5   :  { %s27_s19 = sshll.u32 %s564_s18, 4  ;;  %s565_s20 = smov [#allocation7]   ;;  %s28_s19 = int_to_ptr.vmem [resolvable:$true] %s27_s19 }
   0x6   :  { %s37_s21 = sshll.u32 %s565_s20, 4  ;;  %s503_s22 = scalar_lea.vmem %s28_s19, 256  ;;  %s38_s21 = int_to_ptr.vmem [resolvable:$true] %s37_s21 }
   0x7   :  { %p504_p0 = scmp.ne.s32.totalorder %s28_s19, %s503_s22  ;;  %p508_p1 = scmp.lt.s32.totalorder %s28_s19, %s28_s19 }
   0x8   :  { %p509_p2 = scmp.lt.s32.totalorder %s503_s22, %s503_s22 }
   0xa   :  { %p510_p3 = por %p509_p2, %p508_p1 }
   0xc   :  { %p511_p4 = pnand %p510_p3, %p504_p0 }
   0xe   :  { %514 = shalt.err (!%p511_p4)
}
   0xf   :  { %30 = dma.hbm_to_vmem [thread:$0]  %s726_s1, 256, %s28_s19, [#allocation3]  }
  0x10   :  { %s523_s25 = scalar_lea.vmem %s38_s21, 64  ;;  %p528_p6 = scmp.lt.s32.totalorder %s38_s21, %s38_s21 }
  0x11   :  { %p524_p5 = scmp.ne.s32.totalorder %s38_s21, %s523_s25  ;;  %p529_p7 = scmp.lt.s32.totalorder %s523_s25, %s523_s25 }
  0x13   :  { %p530_p8 = por %p529_p7, %p528_p6 }
  0x15   :  { %p531_p9 = pnand %p530_p8, %p524_p5 }
  0x17   :  { %534 = shalt.err (!%p531_p9)
}
  0x18   :  { %40 = dma.hbm_to_vmem [thread:$0]  %s727_s2, 64, %s38_s21, [#allocation8]  }
  0x19   :  { %555 = dma.done.wait [#allocation5], 16  }
  0x1a   :  { %556 = vsyncadd [#allocation5], 4294967280 }
  0x1b   :  { %557 = dma.done.wait [#allocation3], 256  }
  0x1c   :  { %558 = vsyncadd [#allocation3], 4294967040 }
  0x1d   :  { %559 = dma.done.wait [#allocation8], 64  }
  0x1e   :  { %560 = vsyncadd [#allocation8], 4294967232 }
  0x1f   :  { %52 = sfence }
  0x20   :  { %s451_s1 = sld [smem:[#allocation2 + $0x1]]  ;;  %v83_v0 = vlaneseq  ;;  %v566_v1 = vmov 1983009808   ;;  %v610_v3 = vld [vmem:[#allocation7] sm:$0xf]  ;;  %s567_s14 = smov 16  }
  0x21   :  { %s460_s27 = sld [smem:[#allocation2 + $0xa]]  ;;  %v81_v2 = vunpack.c.l.s4 %v566_v1  ;;  %v618_v6 = vld [vmem:[%s728_s3] sm:$0xf]  ;;  %s568_s17 = smov 17  }
  0x22   :  { %s55_s28 = sld [smem:[#allocation2]]  ;;  %v613_v5 = vshrl.u32 %v83_v0, 7  ;;  %s569_s20 = smov 15  }
  0x23   :  { %s459_s29 = sld [smem:[#allocation2 + $0x9]]  ;;  %v82_v4 = vunpack.c.0.s8 %v81_v2  ;;  %s570_s21 = smov 1  }
  0x24   :  { %s452_s2 = sld [smem:[#allocation2 + $0x2]]  ;;  %s571_s22 = smov 127  }
  0x25   :  { %s461_s6 = sld [smem:[#allocation2 + $0xb]]  ;;  %v622_v10 = vsub.s32 %v82_v4, %v613_v5  ;;  %s572_s23 = smov 113  }
  0x26   :  { %v113_v7 = vstv %s451_s1  ;;  %s453_s7 = sld [smem:[#allocation2 + $0x3]]  ;;  %s573_s24 = smov 112  }
  0x27   :  { %v114_v8 = vmul.f32 %v113_v7, %v610_v3  ;;  %v115_v9 = vstv %s460_s27  ;;  %s462_s8 = sld [smem:[#allocation2 + $0xc]]  ;;  %s574_s25 = smov 111  }
  0x28   :  { %v116_v11 = vmul.f32 %v115_v9, %v618_v6  ;;  %v74_v12 = vstv %s55_s28  ;;  %s625_s9 = sld [smem:[#allocation2 + $0x5]]  ;;  %v682_v9 = vsub.s32 0, %v613_v5  ;;  %s575_s26 = smov [#allocation9]  }
  0x29   :  { %v75_v13 = vmul.f32 %v74_v12, %v610_v3  ;;  %v76_v14 = vstv %s459_s29  ;;  %s628_s3 = sld [smem:[#allocation2 + $0xe]]  ;;  %v137_v12 = vld [vmem:[#allocation6 + $0x1] ss:$8 sm:$0x3]  ;;  %s440_s1 = sshll.u32 %s575_s26, 4  ;;  %s441_s1 = int_to_ptr.vmem [resolvable:$true] %s440_s1 }
  0x2a   :  { %v117_v15 = vadd.f32 %v116_v11, %v114_v8  ;;  %v77_v16 = vmul.f32 %v76_v14, %v618_v6  ;;  %v153_v17 = vstv %s452_s2  ;;  %s631_s10 = sld [smem:[#allocation2 + $0x6]]  ;;  %v679_v8 = vand.u32 127, %v83_v0  ;;  %s535_s27 = scalar_lea.vmem %s441_s1, 64 }
  0x2b   :  { %v154_v18 = vmul.f32 %v153_v17, %v610_v3  ;;  %v155_v19 = vstv %s461_s6  ;;  %s634_s11 = sld [smem:[#allocation2 + $0xf]]  ;;  %v685_v11 = vsub.s32 1, %v613_v5  ;;  %v142_v14 = vrot.slane %v137_v12, %v682_v9  ;;  %p536_p10 = scmp.ne.s32.totalorder %s441_s1, %s535_s27 }
  0x2c   :  { %v125_v20 = vrot.slane %v117_v15, %v622_v10  ;;  %v78_v21 = vadd.f32 %v77_v16, %v75_v13  ;;  %v156_v22 = vmul.f32 %v155_v19, %v618_v6  ;;  %v193_v23 = vstv %s453_s7  ;;  %s638_s12 = sld [smem:[#allocation2 + $0x7]]  ;;  %v177_v16 = vld [vmem:[#allocation6 + $0x2] ss:$8 sm:$0x3]  ;;  %p540_p11 = scmp.lt.s32.totalorder %s441_s1, %s441_s1 }
  0x2d   :  { %v194_v24 = vmul.f32 %v193_v23, %v610_v3  ;;  %v195_v25 = vstv %s462_s8  ;;  %s641_s13 = sld [smem:[#allocation2 + $0x10]]  ;;  %vm133_vm0 = vcmp.lt.s32.totalorder %v679_v8, 16  ;;  %v146_v15 = vrot.slane %v137_v12, %v685_v11  ;;  %v217_v23 = vld [vmem:[#allocation6 + $0x3] ss:$8 sm:$0x3]  ;;  %p541_p12 = scmp.lt.s32.totalorder %s535_s27, %s535_s27 }
  0x2e   :  { %129 = vrot.lane.b32.xlu1 %v125_v20, %s567_s14  ;;  %v126_v26 = vcombine.high %v125_v20, %v125_v20  ;;  %v86_v27 = vrot.slane %v78_v21, %v622_v10  ;;  %v157_v28 = vadd.f32 %v156_v22, %v154_v18  ;;  %v196_v29 = vmul.f32 %v195_v25, %v618_v6  ;;  %s645_s15 = sld [smem:[#allocation2 + $0x8]] }
  0x2f   :  { %v251_v30 = vstv %s625_s9  ;;  %v253_v31 = vstv %s628_s3  ;;  %s649_s16 = sld [smem:[#allocation2 + $0x11]]  ;;  %vm173_vm1 = vcmp.lt.s32.totalorder %v679_v8, 15  ;;  %v182_v5 = vrot.slane %v177_v16, %v682_v9  ;;  %p542_p13 = por %p541_p12, %p540_p11 }
  0x30   :  { %90 = vrot.lane.b32.xlu0 %v86_v27, %s568_s17  ;;  %v165_v32 = vrot.slane %v157_v28, %v622_v10  ;;  %v197_v33 = vadd.f32 %v196_v29, %v194_v24  ;;  %v252_v34 = vmul.f32 %v251_v30, %v610_v3  ;;  %s454_s18 = sld [smem:[#allocation2 + $0x4]]  ;;  %v254_v35 = vmul.f32 %v253_v31, %v618_v6 }
  0x31   :  { %v291_v36 = vstv %s631_s10  ;;  %v293_v37 = vstv %s634_s11  ;;  %s463_s19 = sld [smem:[#allocation2 + $0xd]]  ;;  %v87_v54 = vcombine.high %v86_v27, %v86_v27  ;;  %v186_v22 = vrot.slane %v177_v16, %v685_v11  ;;  %v99_v27 = vld [vmem:[#allocation6] ss:$8 sm:$0x3]  ;;  %p543_p0 = pnand %p542_p13, %p536_p10 }
  0x32   :  { %131 = vrot.lane.b32.xlu1 %v126_v26, %s567_s14  ;;  %v166_v38 = vcombine.high %v165_v32, %v165_v32  ;;  %v292_v39 = vmul.f32 %v291_v36, %v610_v3  ;;  %v294_v40 = vmul.f32 %v293_v37, %v618_v6  ;;  %v255_v41 = vadd.f32 %v254_v35, %v252_v34  ;;  %s468_s0 = sld [smem:[#allocation2 + $0x12]] }
  0x33   :  { %v331_v42 = vstv %s638_s12  ;;  %v333_v43 = vstv %s641_s13  ;;  %v205_v44 = vrot.slane %v197_v33, %v622_v10  ;;  %vm213_vm2 = vcmp.lt.s32.totalorder %v679_v8, 1 }
  0x34   :  { %169 = vrot.lane.b32.xlu0 %v165_v32, %s569_s20  ;;  %v295_v45 = vadd.f32 %v294_v40, %v292_v39  ;;  %v263_v47 = vrot.slane %v255_v41, %v622_v10  ;;  %v332_v48 = vmul.f32 %v331_v42, %v610_v3  ;;  %v334_v49 = vmul.f32 %v333_v43, %v618_v6 }
  0x35   :  { %v206_v46 = vcombine.high %v205_v44, %v205_v44  ;;  %v371_v50 = vstv %s645_s15  ;;  %v373_v51 = vstv %s649_s16  ;;  %v222_v31 = vrot.slane %v217_v23, %v682_v9 }
  0x36   :  { %171 = vrot.lane.b32.xlu1 %v166_v38, %s569_s20  ;;  %v233_v52 = vstv %s454_s18  ;;  %v303_v56 = vrot.slane %v295_v45, %v622_v10  ;;  %v264_v58 = vcombine.high %v263_v47, %v263_v47  ;;  %v335_v59 = vadd.f32 %v334_v49, %v332_v48  ;;  %v275_v38 = vld [vmem:[#allocation6 + $0x4] ss:$8 sm:$0x3] }
  0x37   :  { %v235_v53 = vstv %s463_s19  ;;  %v234_v55 = vmul.f32 %v233_v52, %v610_v3  ;;  %v372_v60 = vmul.f32 %v371_v50, %v610_v3  ;;  %v374_v61 = vmul.f32 %v373_v51, %v618_v6 }
  0x38   :  { %209 = vrot.lane.b32.xlu0 %v205_v44, %s570_s21  ;;  %v236_v57 = vmul.f32 %v235_v53, %v618_v6  ;;  %v304_v1 = vcombine.high %v303_v56, %v303_v56  ;;  %v343_v2 = vrot.slane %v335_v59, %v622_v10  ;;  %v226_v32 = vrot.slane %v217_v23, %v685_v11  ;;  %v315_v44 = vld [vmem:[#allocation6 + $0x5] ss:$8 sm:$0x3] }
  0x39   :  { %v375_v4 = vadd.f32 %v374_v61, %v372_v60  ;;  %vm96_vm3 = vcmp.lt.s32.totalorder %v679_v8, 17  ;;  %v104_v34 = vrot.slane %v99_v27, %v682_v9  ;;  %v108_v35 = vrot.slane %v99_v27, %v685_v11 }
  0x3a   :  { %211 = vrot.lane.b32.xlu1 %v206_v46, %s570_s21  ;;  %v237_v62 = vadd.f32 %v236_v57, %v234_v55  ;;  %v344_v7 = vcombine.high %v343_v2, %v343_v2  ;;  %vm271_vm4 = vcmp.lt.s32.totalorder %v679_v8, 127  ;;  %v280_v48 = vrot.slane %v275_v38, %v682_v9 }
  0x3b   :  { %v383_v3 = vrot.slane %v375_v4, %v622_v10  ;;  %v284_v49 = vrot.slane %v275_v38, %v685_v11  ;;  %vm311_vm5 = vcmp.lt.s32.totalorder %v679_v8, 113  ;;  %v320_v53 = vrot.slane %v315_v44, %v682_v9 }
  0x3c   :  { %92 = vrot.lane.b32.xlu0 %v87_v54, %s568_s17  ;;  %v674_v63 = vrot.slane %v237_v62, %v622_v10  ;;  %v324_v57 = vrot.slane %v315_v44, %v685_v11  ;;  %vm351_vm6 = vcmp.lt.s32.totalorder %v679_v8, 112  ;;  %vm391_vm7 = vcmp.lt.s32.totalorder %v679_v8, 111 }
  0x3d   :  { %v384_v6 = vcombine.high %v383_v3, %v383_v3 }
  0x3e   :  { %269 = vrot.lane.b32.xlu1 %v264_v58, %s571_s22  ;;  %v246_v54 = vcombine.high %v674_v63, %v674_v63 }
  0x40   :  { %267 = vrot.lane.b32.xlu0 %v263_v47, %s571_s22 }
  0x42   :  { %309 = vrot.lane.b32.xlu1 %v304_v1, %s572_s23  ;;  %v355_v1 = vld [vmem:[#allocation6 + $0x6] ss:$8 sm:$0x3] }
  0x43   :  { %v360_v12 = vrot.slane %v355_v1, %v682_v9 }
  0x44   :  { %307 = vrot.lane.b32.xlu0 %v303_v56, %s572_s23 }
  0x46   :  { %349 = vrot.lane.b32.xlu1 %v344_v7, %s573_s24 }
  0x48   :  { %347 = vrot.lane.b32.xlu0 %v343_v2, %s573_s24 }
  0x4a   :  { %389 = vrot.lane.b32.xlu1 %v384_v6, %s574_s25 }
  0x4c   :  { %387 = vrot.lane.b32.xlu0 %v383_v3, %s574_s25 }
  0xa0   :  { %v130_v13 = vpop.permute.xlu1 %129 }
  0xa2   :  { %v91_v10 = vpop.permute.xlu0 %90 }
  0xa4   :  { %v132_v17 = vpop.permute.xlu1 %131 }
  0xa5   :  { %v134_v18 = vsel %vm133_vm0, %v130_v13, %v132_v17  ;;  %v135_v0 = vsel %vm133_vm0, %v132_v17, %v130_v13  ;;  %v364_v13 = vrot.slane %v355_v1, %v685_v11 }
  0xa6   :  { %v149_v19 = vmul.f32 %v142_v14, %v135_v0  ;;  %v150_v20 = vmul.f32 %v146_v15, %v134_v18  ;;  %v170_v21 = vpop.permute.xlu0 %169  ;;  %v395_v18 = vld [vmem:[#allocation6 + $0x7] ss:$8 sm:$0x3] }
  0xa8   :  { %v172_v24 = vpop.permute.xlu1 %171 }
  0xa9   :  { %v174_v25 = vsel %vm173_vm1, %v170_v21, %v172_v24  ;;  %v175_v26 = vsel %vm173_vm1, %v172_v24, %v170_v21 }
  0xaa   :  { %v189_v28 = vmul.f32 %v182_v5, %v175_v26  ;;  %v190_v29 = vmul.f32 %v186_v22, %v174_v25  ;;  %v210_v30 = vpop.permute.xlu0 %209  ;;  %v400_v22 = vrot.slane %v395_v18, %v682_v9 }
  0xac   :  { %v212_v33 = vpop.permute.xlu1 %211 }
  0xad   :  { %v214_v36 = vsel %vm213_vm2, %v210_v30, %v212_v33  ;;  %v215_v37 = vsel %vm213_vm2, %v212_v33, %v210_v30 }
  0xae   :  { %v229_v39 = vmul.f32 %v222_v31, %v215_v37  ;;  %v230_v40 = vmul.f32 %v226_v32, %v214_v36  ;;  %v93_v41 = vpop.permute.xlu0 %92 }
  0xaf   :  { %v97_v42 = vsel %vm96_vm3, %v91_v10, %v93_v41  ;;  %v98_v43 = vsel %vm96_vm3, %v93_v41, %v91_v10 }
  0xb0   :  { %v111_v45 = vmul.f32 %v104_v34, %v98_v43  ;;  %v112_v46 = vmul.f32 %v108_v35, %v97_v42  ;;  %v270_v47 = vpop.permute.xlu1 %269  ;;  %v411_v35 = vstv %s468_s0 }
  0xb2   :  { %v151_v50 = vadd.f32 %v149_v19, %v111_v45  ;;  %v152_v51 = vadd.f32 %v150_v20, %v112_v46  ;;  %v268_v52 = vpop.permute.xlu0 %267 }
  0xb3   :  { %v272_v55 = vsel %vm271_vm4, %v268_v52, %v270_v47  ;;  %v273_v56 = vsel %vm271_vm4, %v270_v47, %v268_v52 }
  0xb4   :  { %v191_v58 = vadd.f32 %v189_v28, %v151_v50  ;;  %v192_v59 = vadd.f32 %v190_v29, %v152_v51  ;;  %v287_v60 = vmul.f32 %v280_v48, %v272_v55  ;;  %v288_v61 = vmul.f32 %v284_v49, %v273_v56  ;;  %v310_v62 = vpop.permute.xlu1 %309 }
  0xb6   :  { %v231_v2 = vadd.f32 %v229_v39, %v191_v58  ;;  %v232_v4 = vadd.f32 %v230_v40, %v192_v59  ;;  %v308_v7 = vpop.permute.xlu0 %307 }
  0xb7   :  { %v312_v3 = vsel %vm311_vm5, %v308_v7, %v310_v62  ;;  %v313_v6 = vsel %vm311_vm5, %v310_v62, %v308_v7 }
  0xb8   :  { %v249_v10 = vadd.f32 %v674_v63, %v231_v2  ;;  %v250_v14 = vadd.f32 %v246_v54, %v232_v4  ;;  %v327_v15 = vmul.f32 %v320_v53, %v312_v3  ;;  %v328_v16 = vmul.f32 %v324_v57, %v313_v6  ;;  %v350_v17 = vpop.permute.xlu1 %349 }
  0xb9   :  { %v404_v63 = vrot.slane %v395_v18, %v685_v11 }
  0xba   :  { %v289_v0 = vadd.f32 %v287_v60, %v249_v10  ;;  %v290_v19 = vadd.f32 %v288_v61, %v250_v14  ;;  %v348_v20 = vpop.permute.xlu0 %347 }
  0xbb   :  { %v352_v21 = vsel %vm351_vm6, %v348_v20, %v350_v17  ;;  %v353_v5 = vsel %vm351_vm6, %v350_v17, %v348_v20 }
  0xbc   :  { %v329_v23 = vadd.f32 %v327_v15, %v289_v0  ;;  %v330_v24 = vadd.f32 %v328_v16, %v290_v19  ;;  %v367_v25 = vmul.f32 %v360_v12, %v352_v21  ;;  %v368_v26 = vmul.f32 %v364_v13, %v353_v5  ;;  %v390_v27 = vpop.permute.xlu1 %389 }
  0xbe   :  { %v369_v28 = vadd.f32 %v367_v25, %v329_v23  ;;  %v370_v29 = vadd.f32 %v368_v26, %v330_v24  ;;  %v388_v30 = vpop.permute.xlu0 %387 }
  0xbf   :  { %v392_v31 = vsel %vm391_vm7, %v388_v30, %v390_v27  ;;  %v393_v32 = vsel %vm391_vm7, %v390_v27, %v388_v30 }
  0xc0   :  { %v407_v33 = vmul.f32 %v400_v22, %v392_v31  ;;  %v408_v34 = vmul.f32 %v404_v63, %v393_v32 }
  0xc2   :  { %v409_v36 = vadd.f32 %v407_v33, %v369_v28  ;;  %v410_v8 = vadd.f32 %v408_v34, %v370_v29 }
  0xc4   :  { %v412_v37 = vadd.f32 %v411_v35, %v409_v36  ;;  %v413_v38 = vadd.f32 %v411_v35, %v410_v8 }
  0xc6   :  { %v414_v9 = vmul.f32 0.5, %v412_v37  ;;  %v415_v39 = vmul.f32 0.5, %v413_v38 }
  0xc8   :  { %483 = vtanh.f32 %v414_v9 }
  0xc9   :  { %485 = vtanh.f32 %v415_v39 }
  0xd5   :  { %v484_v11 = vpop.eup %483 }
  0xd6   :  { %v486_v40 = vpop.eup %485  ;;  %v418_v41 = vmul.f32 0.5, %v484_v11 }
  0xd7   :  { %v419_v42 = vmul.f32 0.5, %v486_v40 }
  0xd8   :  { %v420_v43 = vadd.f32 0.5, %v418_v41 }
  0xd9   :  { %v421_v44 = vadd.f32 0.5, %v419_v42 }
  0xdb   :  { %v424_v45 = vcombine.low %v420_v43, %v421_v44 }
  0xdd   :  { %469 = vst.sshfl [vmem:[#allocation9] sm:$0x33 pattern:$0x76325410] %v424_v45 }
  0xde   :  { %546 = shalt.err (!%p543_p0)
}
  0xdf   :  { %443 = dma.vmem_to_hbm [thread:$0]  %s441_s1, 64, %s729_s4, [#allocation4]  }
  0xe0   :  { %561 = dma.done.wait [#allocation4], 64  }
  0xe1   :  { %562 = vsyncadd [#allocation4], 4294967232 }
  0xe2   :  { %447 = vsyncpa [#allocation3], 1 }
  0xe3   :  { %448 = vsyncpa [#allocation8], 1 }
  0xe4   :  { %449 = vsyncpa [#allocation4], 1 }
  0xe5   :  { %450 = vsyncpa [#allocation5], 1 }

</bundles_post_ra>
